<compile_context>
chip_gen: v6e
topology: v6e:2x2x1
jax: 0.10.0
libtpu: 0.0.40
codegen_flags: <defaults>
</compile_context>

<pallas_src>
import math
from functools import partial

import jax
import jax.numpy as jnp
from jax.experimental import pallas as pl
from jax.experimental.pallas import tpu as pltpu

_LANES = 128                 # TPU vreg lane width
_SMALL_BYTES = 2 << 20       # below this, use a single-block (no-grid) call
_MAX_TILE_BYTES = 8 << 20    # per-tile x upper bound (per perf review)


def _build_pe_table(model_dim: int, max_seq_len: int) -> jnp.ndarray:
    """Reproduces the PyTorch __init__ double loop exactly (float32).

    Column c uses divisor 10000 ** (2 * c / model_dim); even columns take sin,
    odd columns take cos (matches the reference module's loop, which differs
    from the "classic" transformer table where each sin/cos pair shares a
    divisor).
    """
    pos = jnp.arange(max_seq_len, dtype=jnp.float32)[:, None]          # (S, 1)
    col = jnp.arange(model_dim, dtype=jnp.float32)[None, :]            # (1, D)
    div = jnp.power(jnp.float32(10000.0), 2.0 * col / float(model_dim))
    angle = pos / div                                                  # (S, D)
    even = (jnp.arange(model_dim) % 2 == 0)[None, :]
    return jnp.where(even, jnp.sin(angle), jnp.cos(angle)).astype(jnp.float32)


def _add_pe_kernel(x_ref, pe_ref, o_ref, *, scale: float):
    # Tiled path: x_ref / pe_ref / o_ref are all (tile_rows, L) -> no broadcast.
    # Small (no-grid) path: x_ref/o_ref are (B, S, D), pe_ref is (S, D) and
    # broadcasts over the leading batch dim (trivial at those sizes).
    # Compute in f32 in-register regardless of input dtype (parity with an f32
    # torch reference for bf16 inputs); casts are no-ops for f32 inputs.
    x = x_ref[...].astype(jnp.float32)
    pe = pe_ref[...].astype(jnp.float32)
    o_ref[...] = (x * scale + pe).astype(o_ref.dtype)


def _vmem_budget():
    """Generation-aware (vmem_limit_bytes, tile_bytes)."""
    try:
        cap = int(pltpu.get_tpu_info().vmem_capacity_bytes)
    except Exception:
        cap = 64 << 20                     # conservative: v7x is 64 MiB / TC
    # Leave headroom for compiler scratch: 48 MiB on v7x, 64 MiB on v5e/v6e.
    vmem_limit = min(cap * 3 // 4, 64 << 20)
    # Footprint = x(2-buf) + out(2-buf) + pe(1-buf) = 5 tiles; divide by 6 for
    # slack.  Yields 8 MiB tiles on all current generations.
    tile_bytes = min(_MAX_TILE_BYTES, vmem_limit // 6)
    return vmem_limit, tile_bytes


def _tiled_add_pe(kernel, x3, pe2, tile_rows, vmem_limit, single_buffer_pe):
    """x3: (B, R, L), pe2: (R, L).

    Grid is (row_tiles, batch) with the row-tile axis OUTER and batch INNER so
    the pe block index does not change across the inner loop (pe tile stays
    resident in VMEM; no re-DMA per batch element)."""
    B, R, L = x3.shape
    grid_r = pl.cdiv(R, tile_rows)
    pe_kwargs = {}
    if single_buffer_pe:
        # pe's block index changes only once per B inner steps -> one buffer.
        pe_kwargs["pipeline_mode"] = pl.Buffered(1)
    return pl.pallas_call(
        kernel,
        out_shape=jax.ShapeDtypeStruct((B, R, L), x3.dtype),
        grid_spec=pltpu.PrefetchScalarGridSpec(
            num_scalar_prefetch=0,
            grid=(grid_r, B),                                   # r outer, b inner
            in_specs=[
                # batch dim squeezed away -> kernel sees a (tile_rows, L) ref
                pl.BlockSpec((pl.Squeezed(), tile_rows, L),
                             lambda r, b: (b, r, 0)),
                # pe block index independent of b -> resident across batch loop
                pl.BlockSpec((tile_rows, L), lambda r, b: (r, 0), **pe_kwargs),
            ],
            out_specs=pl.BlockSpec((pl.Squeezed(), tile_rows, L),
                                   lambda r, b: (b, r, 0)),
        ),
        compiler_params=pltpu.CompilerParams(
            dimension_semantics=("parallel", "parallel"),
            vmem_limit_bytes=int(vmem_limit)),
    )(x3, pe2)


def positional_encoder(x: jnp.ndarray, pe_full: jnp.ndarray,
                       model_dim: int) -> jnp.ndarray:
    """Forward pass: out = x * sqrt(model_dim) + pe[:seq_len]."""
    B, S, D = x.shape
    assert D == model_dim
    scale = math.sqrt(model_dim)
    # Pre-cast pe to x.dtype: halves pe HBM bandwidth for bf16 inputs (the
    # kernel upcasts in-register for the actual math).
    pe = pe_full[:S, :].astype(x.dtype)
    kernel = partial(_add_pe_kernel, scale=scale)

    itemsize = jnp.dtype(x.dtype).itemsize
    F = S * D

    # Tiny inputs: a single block with no grid; per-grid-step overhead would
    # dominate at these sizes.
    if B * F * itemsize <= _SMALL_BYTES:
        return pl.pallas_call(
            kernel,
            out_shape=jax.ShapeDtypeStruct(x.shape, x.dtype),
        )(x, pe)

    if F % _LANES == 0:
        # Lane-dense view: (S, D) plane becomes (R, 128) rows -> unmasked,
        # full-lane stores regardless of model_dim.
        R, L = F // _LANES, _LANES
        x3 = x.reshape(B, R, L)
        pe2 = pe.reshape(R, L)
    else:
        # TODO(synk): non-128-multiple S*D falls back to L=D (masked partial
        # stores / lane padding when D % 128 != 0); pad model_dim to a
        # multiple of 128 at the model level to avoid this path.
        R, L = S, D
        x3, pe2 = x, pe

    vmem_limit, tile_bytes = _vmem_budget()
    sublane = max(8, 32 // itemsize)       # packed sublanes: 8 f32/16 bf16/32 i8
    rows = max(sublane, tile_bytes // (L * itemsize))
    if rows >= R:
        rows = R                                          # full dim: always legal
    else:
        rows = max(sublane, (rows // sublane) * sublane)  # sublane-aligned tile

    # v7x megacore balance: if batch is odd (incl. 1) it can't split evenly
    # across the two TensorCores; make the row-tile axis have >= 2 steps so the
    # cores share the plane instead.
    if rows == R and (B % 2 == 1) and R >= 2 * sublane:
        half = pl.cdiv(R, 2)
        rows = min(R, ((half + sublane - 1) // sublane) * sublane)

    try:
        out3 = _tiled_add_pe(kernel, x3, pe2, rows, vmem_limit,
                             single_buffer_pe=True)
    except Exception:
        # Installed jax/libtpu rejects pl.Buffered(1): fall back to the default
        # double-buffered pe spec (same semantics, slightly larger footprint).
        out3 = _tiled_add_pe(kernel, x3, pe2, rows, vmem_limit,
                             single_buffer_pe=False)
    return out3.reshape(B, S, D)


if __name__ == "__main__":
    # --- Test 1: module-consistent toy shapes (exercises the no-grid path) ---
    model_dim, max_seq_len, batch, seq_len = 32, 16, 2, 8
    pe_full = _build_pe_table(model_dim, max_seq_len)           # (max_seq_len, D)
    key = jax.random.PRNGKey(0)
    x = jax.random.normal(key, (batch, seq_len, model_dim), dtype=jnp.float32)
    ref = x * math.sqrt(model_dim) + pe_full[None, :seq_len, :]

    out = jax.block_until_ready(positional_encoder(x, pe_full, model_dim))
    assert out.shape == (batch, seq_len, model_dim)
    assert jnp.allclose(out, ref, atol=1e-5, rtol=1e-5)

    # --- Test 2: larger shape (exercises the tiled, lane-dense grid path) ---
    model_dim2, seq_len2, batch2 = 256, 1024, 4
    pe_full2 = _build_pe_table(model_dim2, seq_len2)
    x2 = jax.random.normal(jax.random.PRNGKey(0),
                           (batch2, seq_len2, model_dim2), dtype=jnp.float32)
    ref2 = x2 * math.sqrt(model_dim2) + pe_full2[None, :seq_len2, :]

    out2 = jax.block_until_ready(positional_encoder(x2, pe_full2, model_dim2))
    assert out2.shape == (batch2, seq_len2, model_dim2)
    assert jnp.allclose(out2, ref2, atol=1e-4, rtol=1e-4)

    # --- Test 3: odd batch + bf16 (megacore row-split & packed-sublane path) ---
    x3 = jax.random.normal(jax.random.PRNGKey(0),
                           (3, seq_len2, model_dim2), dtype=jnp.bfloat16)
    ref3 = (x3.astype(jnp.float32) * math.sqrt(model_dim2)
            + pe_full2[None, :seq_len2, :]).astype(jnp.bfloat16)
    out3 = jax.block_until_ready(positional_encoder(x3, pe_full2, model_dim2))
    assert out3.shape == (3, seq_len2, model_dim2)
    assert jnp.allclose(out3.astype(jnp.float32), ref3.astype(jnp.float32),
                        atol=2e-2, rtol=2e-2)

    print("KERNEL_OK")
</pallas_src>

<mosaic_0001>
module attributes {stable_mosaic.version = 11 : i64} {
  func.func @_add_pe_kernel(%arg0: memref<2x8x32xf32, #tpu.memory_space<vmem>>, %arg1: memref<8x32xf32, #tpu.memory_space<vmem>>, %arg2: memref<2x8x32xf32, #tpu.memory_space<vmem>>) attributes {dimension_semantics = [], scalar_prefetch = 0 : i64, scratch_operands = 0 : i64, tpu.core_type = #tpu.core_type<tc>} {
    %c0 = arith.constant 0 : index
    %c0_0 = arith.constant 0 : index
    %c0_1 = arith.constant 0 : index
    %0 = vector.load %arg0[%c0, %c0_0, %c0_1] : memref<2x8x32xf32, #tpu.memory_space<vmem>>, vector<2x8x32xf32>
    %c0_2 = arith.constant 0 : index
    %c0_3 = arith.constant 0 : index
    %1 = vector.load %arg1[%c0_2, %c0_3] : memref<8x32xf32, #tpu.memory_space<vmem>>, vector<8x32xf32>
    %cst = arith.constant 5.65685415 : f32
    %2 = vector.broadcast %cst : f32 to vector<2x8x32xf32>
    %3 = arith.mulf %0, %2 : vector<2x8x32xf32>
    %4 = vector.shape_cast %1 : vector<8x32xf32> to vector<1x8x32xf32>
    %5 = vector.broadcast %4 : vector<1x8x32xf32> to vector<2x8x32xf32>
    %6 = arith.addf %3, %5 : vector<2x8x32xf32>
    %c0_4 = arith.constant 0 : index
    %c0_5 = arith.constant 0 : index
    %c0_6 = arith.constant 0 : index
    %7 = vector.load %arg2[%c0_4, %c0_5, %c0_6] : memref<2x8x32xf32, #tpu.memory_space<vmem>>, vector<2x8x32xf32>
    tpu.vector_store %arg2[%c0_4, %c0_5, %c0_6], %6 {strides = array<i32>} : memref<2x8x32xf32, #tpu.memory_space<vmem>>, vector<2x8x32xf32>,
    return
  }
}

</mosaic_0001>

<bundles_post_ra>
// kernel: tpu_custom_call.1
= control target key start
LH: loop header
LB: loop body
LE: loop exit
PB: predicated region body
PF: predicated region fallthrough
CT: control target
= control target key end

     0   :  { %7 = vsyncpa [#allocation3], 0  ;;  %s172_s0 = inlined_call_operand.hbm [shape: f32[2,8,32], index: 0, kind: input, shape index: {}]   ;;  %s173_s1 = inlined_call_operand.hbm [shape: f32[8,32], index: 1, kind: input, shape index: {}]   ;;  %s174_s2 = inlined_call_operand.hbm [shape: f32[2,8,32], index: 2, kind: output, shape index: {}]  }
   0x1   :  { %8 = vsyncpa [#allocation6], 0 }
   0x2   :  { %9 = vsyncpa [#allocation4], 0  ;;  %s137_s9 = smov [#allocation2]  }
   0x3   :  { %s15_s10 = sshll.u32 %s137_s9, 4  ;;  %s16_s10 = int_to_ptr.vmem [resolvable:$true] %s15_s10 }
   0x4   :  { %s79_s11 = scalar_lea.vmem %s16_s10, 256  ;;  %p84_p1 = scmp.lt.s32.totalorder %s16_s10, %s16_s10 }
   0x5   :  { %p80_p0 = scmp.ne.s32.totalorder %s16_s10, %s79_s11  ;;  %p85_p2 = scmp.lt.s32.totalorder %s79_s11, %s79_s11 }
   0x7   :  { %p86_p3 = por %p85_p2, %p84_p1 }
   0x9   :  { %p87_p4 = pnand %p86_p3, %p80_p0 }
   0xb   :  { %90 = shalt.err (!%p87_p4)
}
   0xc   :  { %s138_s12 = smov 128   ;;  %s139_s13 = smov 8  }
   0xd   :  { %21 = dma.hbm_to_vmem [thread:$0]  %s172_s0, 256, %s16_s10, [#allocation3], %s138_s12, %s138_s12, %s139_s13  }
   0xe   :  { %s140_s16 = smov [#allocation5]  }
   0xf   :  { %s28_s17 = sshll.u32 %s140_s16, 4  ;;  %s29_s17 = int_to_ptr.vmem [resolvable:$true] %s28_s17 }
  0x10   :  { %s99_s18 = scalar_lea.vmem %s29_s17, 128  ;;  %p104_p6 = scmp.lt.s32.totalorder %s29_s17, %s29_s17 }
  0x11   :  { %p100_p5 = scmp.ne.s32.totalorder %s29_s17, %s99_s18  ;;  %p105_p7 = scmp.lt.s32.totalorder %s99_s18, %s99_s18 }
  0x13   :  { %p106_p8 = por %p105_p7, %p104_p6 }
  0x15   :  { %p107_p9 = pnand %p106_p8, %p100_p5 }
  0x17   :  { %110 = shalt.err (!%p107_p9)
}
  0x18   :  { %31 = dma.hbm_to_vmem [thread:$0]  %s173_s1, 128, %s29_s17, [#allocation6]  }
  0x19   :  { %131 = dma.done.wait [#allocation3], 256  }
  0x1a   :  { %132 = vsyncadd [#allocation3], 4294967040 }
  0x1b   :  { %133 = dma.done.wait [#allocation6], 128  }
  0x1c   :  { %134 = vsyncadd [#allocation6], 4294967168  ;;  %v38_v0 = vld [vmem:[#allocation2] sm:$0xff]  ;;  %v40_v1 = vld [vmem:[#allocation5] sm:$0xff]  ;;  %s141_s0 = smov [#allocation7]   ;;  %vm45_vm0 = vcmask 261120  }
  0x1d   :  { %v39_v2 = vld [vmem:[#allocation2 + $0x8] sm:$0xff]  ;;  %s53_s21 = sshll.u32 %s141_s0, 4  ;;  %v41_v3 = vmul.f32 5.656854, %v38_v0  ;;  %s54_s21 = int_to_ptr.vmem [resolvable:$true] %s53_s21 }
  0x1e   :  { %v42_v4 = vmul.f32 5.656854, %v39_v2  ;;  %s111_s22 = scalar_lea.vmem %s54_s21, 256  ;;  %p116_p11 = scmp.lt.s32.totalorder %s54_s21, %s54_s21 }
  0x1f   :  { %v43_v5 = vadd.f32 %v41_v3, %v40_v1  ;;  %p112_p10 = scmp.ne.s32.totalorder %s54_s21, %s111_s22  ;;  %p117_p12 = scmp.lt.s32.totalorder %s111_s22, %s111_s22 }
  0x20   :  { %v44_v6 = vadd.f32 %v42_v4, %v40_v1 }
  0x21   :  { %46 = vst.msk [vmem:[#allocation7] sm:$0xff] %vm45_vm0, %v43_v5  ;;  %p118_p13 = por %p117_p12, %p116_p11 }
  0x22   :  { %47 = vst.msk [vmem:[#allocation7 + $0x8] sm:$0xff] %vm45_vm0, %v44_v6 }
  0x23   :  { %p119_p0 = pnand %p118_p13, %p112_p10 }
  0x25   :  { %122 = shalt.err (!%p119_p0)
}
  0x26   :  { %59 = dma.vmem_to_hbm [thread:$0]  %s54_s21, 256, %s174_s2, [#allocation4], %s138_s12, %s138_s12, %s139_s13  }
  0x27   :  { %135 = dma.done.wait [#allocation4], 256  }
  0x28   :  { %136 = vsyncadd [#allocation4], 4294967040 }
  0x29   :  { %63 = vsyncpa [#allocation3], 1 }
  0x2a   :  { %64 = vsyncpa [#allocation6], 1 }
  0x2b   :  { %65 = vsyncpa [#allocation4], 1 }

</bundles_post_ra>
